<compile_context>
chip_gen: v5e
topology: v5e:2x2
jax: 0.10.0
libtpu: 0.0.40
codegen_flags: <defaults>
</compile_context>

<pallas_src>
import functools

import jax
import jax.numpy as jnp
from jax import lax
from jax.experimental import pallas as pl
from jax.experimental.pallas import tpu as pltpu


# --------------------------------------------------------------------------
# in-kernel helpers / kernels
# --------------------------------------------------------------------------
def _fill_im2col(im2_ref, src, c, hp, wp):
    """Build im2col rows for a 3x3 'same' conv on the flattened padded grid.

    `src` is (c, hp*wp): a zero-padded image, flat index q = y*wp + x.
    Tap t = dy*3+dx occupies rows [t*c, (t+1)*c) and holds src shifted by
    o = (dy-1)*wp + (dx-1) lanes.  Out-of-range lanes stay zero; they only
    influence halo outputs, which are masked/discarded downstream.
    """
    npad = hp * wp
    im2_ref[...] = jnp.zeros(im2_ref.shape, im2_ref.dtype)   # tiny scratch
    for dy in range(3):
        for dx in range(3):
            o = (dy - 1) * wp + (dx - 1)
            r0 = (dy * 3 + dx) * c
            if o >= 0:
                im2_ref[r0:r0 + c, 0:npad - o] = src[:, o:npad]
            else:
                im2_ref[r0:r0 + c, -o:npad] = src[:, 0:npad + o]


def _conv1_skip_kernel(x_ref, mask_ref, wc_ref, out_ref, stats_ref, im2_ref,
                       *, cin, cout, hp, wp):
    # x_ref:    (cin, hp*wp)      zero-padded input image (flat spatial lanes)
    # mask_ref: (1,   hp*wp)      1.0 on interior pixels, 0.0 on the halo
    # wc_ref:   (2*cout, 9*cin)   rows [:cout] 3x3 conv1, rows [cout:] 1x1 skip
    # out_ref:  (2*cout, hp*wp)   conv1 pre-BN output ++ skip output
    # stats_ref:(cout, 2)         per-image (sum, sum^2) of conv1 pre-BN
    _fill_im2col(im2_ref, x_ref, cin, hp, wp)
    y = jnp.dot(wc_ref[...], im2_ref[...], preferred_element_type=jnp.float32)
    out_ref[...] = y.astype(out_ref.dtype)
    hm = y[0:cout, :] * mask_ref[...]                 # drop halo before reduce
    stats_ref[:, 0:1] = jnp.sum(hm, axis=1, keepdims=True)
    stats_ref[:, 1:2] = jnp.sum(hm * hm, axis=1, keepdims=True)


def _bn1_conv2_kernel(h1_ref, mask_ref, sc1_ref, sh1_ref, w2_ref,
                      out_ref, stats_ref, im2_ref, *, cout, hp, wp):
    # fused BN1 affine + ReLU, halo re-zeroed, then conv2 as one im2col matmul
    h1 = jnp.maximum(sc1_ref[...] * h1_ref[...] + sh1_ref[...], 0.0)
    h1 = h1 * mask_ref[...]
    _fill_im2col(im2_ref, h1.astype(im2_ref.dtype), cout, hp, wp)
    y = jnp.dot(w2_ref[...], im2_ref[...], preferred_element_type=jnp.float32)
    out_ref[...] = y.astype(out_ref.dtype)
    hm = y * mask_ref[...]
    stats_ref[:, 0:1] = jnp.sum(hm, axis=1, keepdims=True)
    stats_ref[:, 1:2] = jnp.sum(hm * hm, axis=1, keepdims=True)


def _bn2_residual_kernel(h2_ref, skip_ref, sc2_ref, sh2_ref, out_ref):
    # BN2 affine (skip bias folded into sh2) + residual add + final ReLU
    out_ref[...] = jnp.maximum(
        sc2_ref[...] * h2_ref[...] + sh2_ref[...] + skip_ref[...], 0.0
    ).astype(out_ref.dtype)


# --------------------------------------------------------------------------
# wrapper
# --------------------------------------------------------------------------
def residual_conv(x_nchw, params, *, eps=1e-5):
    N, Cin, H, W = x_nchw.shape
    Cout = params["w1"].shape[-1]
    Hp, Wp = H + 2, W + 2
    Npad = Hp * Wp
    cin_p = max(8, -(-Cin // 8) * 8)          # pad Cin to a sublane multiple
    f32 = jnp.float32
    dtype = x_nchw.dtype

    # ---- tiny XLA-side prep: padded flat input, halo mask, matmul-layout weights
    xpad = jnp.pad(x_nchw, ((0, 0), (0, cin_p - Cin), (1, 1), (1, 1)))
    xpad = xpad.reshape(N, cin_p, Npad)

    row = jnp.arange(Hp)[:, None]
    col = jnp.arange(Wp)[None, :]
    mask = (((row >= 1) & (row <= H) & (col >= 1) & (col <= W))
            .astype(f32).reshape(1, Npad))

    w1 = jnp.pad(params["w1"], ((0, 0), (0, 0), (0, cin_p - Cin), (0, 0)))
    w1mat = jnp.transpose(w1, (3, 0, 1, 2)).reshape(Cout, 9 * cin_p)
    ws_p = jnp.pad(params["ws"], ((0, cin_p - Cin), (0, 0)))        # (cin_p, Cout)
    wskip = jnp.zeros((Cout, 9 * cin_p), f32)
    wskip = wskip.at[:, 4 * cin_p:5 * cin_p].set(ws_p.T)            # centre tap
    wc1 = jnp.concatenate([w1mat, wskip], axis=0)                   # (2*Cout, 9*cin_p)
    w2mat = jnp.transpose(params["w2"], (3, 0, 1, 2)).reshape(Cout, 9 * Cout)
    # conv biases b1/b2 intentionally dropped: cancelled by BN mean subtraction.

    cparams = pltpu.CompilerParams(
        dimension_semantics=("parallel",),       # batch blocks -> both v7x TCs
        vmem_limit_bytes=32 * 1024 * 1024)

    def full(shape):
        return pl.BlockSpec(shape, lambda n: (0,) * len(shape))

    def per_n(r, c, blk=0):
        return pl.BlockSpec((None, r, c), lambda n, _b=blk: (n, _b, 0))

    # ---- pass A: conv1 + 1x1 skip in a single MXU matmul, + BN1 stat partials
    a_out, stats1 = pl.pallas_call(
        functools.partial(_conv1_skip_kernel, cin=cin_p, cout=Cout, hp=Hp, wp=Wp),
        grid=(N,),
        in_specs=[per_n(cin_p, Npad), full((1, Npad)), full((2 * Cout, 9 * cin_p))],
        out_specs=[per_n(2 * Cout, Npad), per_n(Cout, 2)],
        out_shape=[jax.ShapeDtypeStruct((N, 2 * Cout, Npad), f32),
                   jax.ShapeDtypeStruct((N, Cout, 2), f32)],
        scratch_shapes=[pltpu.VMEM((9 * cin_p, Npad), xpad.dtype)],
        compiler_params=cparams,
    )(xpad, mask, wc1)

    # ---- finalize BN1 on tiny (Cout,) vectors (E[x^2]-E[x]^2 in f32)
    cnt = float(N * H * W)
    tot1 = jnp.sum(stats1, axis=0)
    mean1 = tot1[:, 0] / cnt
    var1 = jnp.maximum(tot1[:, 1] / cnt - mean1 * mean1, 0.0)
    g1 = params["g1"].reshape(Cout)
    be1 = params["be1"].reshape(Cout)
    sc1 = (g1 * lax.rsqrt(var1 + eps)).reshape(Cout, 1).astype(f32)
    sh1 = (be1 - sc1[:, 0] * mean1).reshape(Cout, 1).astype(f32)

    # ---- pass B: BN1 affine + ReLU + conv2 (single matmul) + BN2 stat partials
    h2, stats2 = pl.pallas_call(
        functools.partial(_bn1_conv2_kernel, cout=Cout, hp=Hp, wp=Wp),
        grid=(N,),
        in_specs=[per_n(Cout, Npad, blk=0),          # rows [0:Cout] of a_out
                  full((1, Npad)), full((Cout, 1)), full((Cout, 1)),
                  full((Cout, 9 * Cout))],
        out_specs=[per_n(Cout, Npad), per_n(Cout, 2)],
        out_shape=[jax.ShapeDtypeStruct((N, Cout, Npad), f32),
                   jax.ShapeDtypeStruct((N, Cout, 2), f32)],
        scratch_shapes=[pltpu.VMEM((9 * Cout, Npad), f32)],
        compiler_params=cparams,
    )(a_out, mask, sc1, sh1, w2mat)

    # ---- finalize BN2 (skip bias folded into the shift)
    tot2 = jnp.sum(stats2, axis=0)
    mean2 = tot2[:, 0] / cnt
    var2 = jnp.maximum(tot2[:, 1] / cnt - mean2 * mean2, 0.0)
    g2 = params["g2"].reshape(Cout)
    be2 = params["be2"].reshape(Cout)
    bs = params["bs"].reshape(Cout)
    sc2 = (g2 * lax.rsqrt(var2 + eps)).reshape(Cout, 1).astype(f32)
    sh2 = (be2 - sc2[:, 0] * mean2 + bs).reshape(Cout, 1).astype(f32)

    # ---- pass C: BN2 affine + residual add + final ReLU
    out_pad = pl.pallas_call(
        _bn2_residual_kernel,
        grid=(N,),
        in_specs=[per_n(Cout, Npad, blk=0),          # conv2 pre-BN
                  per_n(Cout, Npad, blk=1),          # skip rows [Cout:2*Cout] of a_out
                  full((Cout, 1)), full((Cout, 1))],
        out_specs=per_n(Cout, Npad),
        out_shape=jax.ShapeDtypeStruct((N, Cout, Npad), dtype),
        compiler_params=cparams,
    )(h2, a_out, sc2, sh2)

    # crop the 1-pixel halo; layout is already NCHW (no transpose needed)
    return out_pad.reshape(N, Cout, Hp, Wp)[:, :, 1:H + 1, 1:W + 1]


# --------------------------------------------------------------------------
# params + pure-JAX reference (for a sanity check)
# --------------------------------------------------------------------------
def init_params(key, in_channels, out_channels):
    ks = jax.random.split(key, 10)
    f32 = jnp.float32
    return {
        "w1": 0.1 * jax.random.normal(ks[0], (3, 3, in_channels, out_channels), f32),
        "b1": 0.1 * jax.random.normal(ks[1], (1, out_channels), f32),
        "g1": 1.0 + 0.1 * jax.random.normal(ks[2], (1, out_channels), f32),
        "be1": 0.1 * jax.random.normal(ks[3], (1, out_channels), f32),
        "w2": 0.1 * jax.random.normal(ks[4], (3, 3, out_channels, out_channels), f32),
        "b2": 0.1 * jax.random.normal(ks[5], (1, out_channels), f32),
        "g2": 1.0 + 0.1 * jax.random.normal(ks[6], (1, out_channels), f32),
        "be2": 0.1 * jax.random.normal(ks[7], (1, out_channels), f32),
        "ws": 0.1 * jax.random.normal(ks[8], (in_channels, out_channels), f32),
        "bs": 0.1 * jax.random.normal(ks[9], (1, out_channels), f32),
    }


def _reference(x, params, eps=1e-5):
    dn = ("NCHW", "HWIO", "NCHW")

    def conv3x3(h, w, b):
        y = lax.conv_general_dilated(h, w, (1, 1), ((1, 1), (1, 1)),
                                     dimension_numbers=dn)
        return y + b.reshape(1, -1, 1, 1)

    def bn(h, g, be):
        mu = jnp.mean(h, axis=(0, 2, 3), keepdims=True)
        var = jnp.mean((h - mu) ** 2, axis=(0, 2, 3), keepdims=True)
        return (g.reshape(1, -1, 1, 1) * (h - mu) * lax.rsqrt(var + eps)
                + be.reshape(1, -1, 1, 1))

    h = conv3x3(x, params["w1"], params["b1"])
    h = jnp.maximum(bn(h, params["g1"], params["be1"]), 0.0)
    h = conv3x3(h, params["w2"], params["b2"])
    h = bn(h, params["g2"], params["be2"])
    skip = jnp.einsum("nchw,cd->ndhw", x, params["ws"])
    skip = skip + params["bs"].reshape(1, -1, 1, 1)
    return jnp.maximum(h + skip, 0.0)


if __name__ == "__main__":
    key = jax.random.PRNGKey(0)
    kx, kp = jax.random.split(key)

    in_channels, out_channels = 4, 8
    x = jax.random.normal(kx, (2, in_channels, 16, 16), jnp.float32)   # NCHW
    params = init_params(kp, in_channels, out_channels)

    y = jax.jit(residual_conv)(x, params)
    jax.block_until_ready(y)
    assert y.shape == (2, out_channels, 16, 16)

    y_ref = _reference(x, params)
    err = float(jnp.max(jnp.abs(y - y_ref)))
    assert err < 1e-1, f"mismatch vs reference: max abs err = {err}"
    print("KERNEL_OK")
</pallas_src>

<mosaic_0001>
module attributes {stable_mosaic.version = 11 : i64} {
  func.func @_bn2_residual_kernel(%arg0: i32, %arg1: memref<1x8x324xf32, #tpu.memory_space<vmem>>, %arg2: memref<1x8x324xf32, #tpu.memory_space<vmem>>, %arg3: memref<8x1xf32, #tpu.memory_space<vmem>>, %arg4: memref<8x1xf32, #tpu.memory_space<vmem>>, %arg5: memref<1x8x324xf32, #tpu.memory_space<vmem>>) attributes {dimension_semantics = [#tpu.dimension_semantics<parallel>], iteration_bounds = array<i64: 2>, scalar_prefetch = 0 : i64, scratch_operands = 0 : i64, tpu.core_type = #tpu.core_type<tc>, window_params = [{transform_indices = @transform_0, window_bounds = array<i64: 1, 8, 324>}, {transform_indices = @transform_1, window_bounds = array<i64: 1, 8, 324>}, {pipeline_mode = #tpu.pipeline_mode<synchronous>, transform_indices = @transform_2, window_bounds = array<i64: 8, 1>}, {pipeline_mode = #tpu.pipeline_mode<synchronous>, transform_indices = @transform_3, window_bounds = array<i64: 8, 1>}, {transform_indices = @transform_4, window_bounds = array<i64: 1, 8, 324>}]} {
    %c0 = arith.constant 0 : index
    %c0_0 = arith.constant 0 : index
    %0 = vector.load %arg3[%c0, %c0_0] : memref<8x1xf32, #tpu.memory_space<vmem>>, vector<8x1xf32>
    %c0_1 = arith.constant 0 : index
    %c0_2 = arith.constant 0 : index
    %c0_3 = arith.constant 0 : index
    %1 = vector.load %arg1[%c0_1, %c0_2, %c0_3] : memref<1x8x324xf32, #tpu.memory_space<vmem>>, vector<1x8x324xf32>
    %2 = vector.shape_cast %1 : vector<1x8x324xf32> to vector<8x324xf32>
    %3 = vector.broadcast %0 : vector<8x1xf32> to vector<8x324xf32>
    %4 = arith.mulf %3, %2 : vector<8x324xf32>
    %c0_4 = arith.constant 0 : index
    %c0_5 = arith.constant 0 : index
    %5 = vector.load %arg4[%c0_4, %c0_5] : memref<8x1xf32, #tpu.memory_space<vmem>>, vector<8x1xf32>
    %6 = vector.broadcast %5 : vector<8x1xf32> to vector<8x324xf32>
    %7 = arith.addf %4, %6 : vector<8x324xf32>
    %c0_6 = arith.constant 0 : index
    %c0_7 = arith.constant 0 : index
    %c0_8 = arith.constant 0 : index
    %8 = vector.load %arg2[%c0_6, %c0_7, %c0_8] : memref<1x8x324xf32, #tpu.memory_space<vmem>>, vector<1x8x324xf32>
    %9 = vector.shape_cast %8 : vector<1x8x324xf32> to vector<8x324xf32>
    %10 = arith.addf %7, %9 : vector<8x324xf32>
    %cst = arith.constant 0.000000e+00 : f32
    %11 = vector.broadcast %cst : f32 to vector<8x324xf32>
    %12 = arith.maximumf %10, %11 : vector<8x324xf32>
    %c0_9 = arith.constant 0 : index
    %c0_10 = arith.constant 0 : index
    %c0_11 = arith.constant 0 : index
    %13 = vector.load %arg5[%c0_9, %c0_10, %c0_11] : memref<1x8x324xf32, #tpu.memory_space<vmem>>, vector<1x8x324xf32>
    %14 = vector.shape_cast %13 : vector<1x8x324xf32> to vector<8x324xf32>
    %15 = vector.shape_cast %12 : vector<8x324xf32> to vector<1x8x324xf32>
    tpu.vector_store %arg5[%c0_9, %c0_10, %c0_11], %15 {strides = array<i32>} : memref<1x8x324xf32, #tpu.memory_space<vmem>>, vector<1x8x324xf32>,
    return
  }
  func.func @transform_0(%arg0: i32) -> (i32, i32, i32) {
    %c0_i32 = arith.constant 0 : i32
    %c0_i32_0 = arith.constant 0 : i32
    %c0_i32_1 = arith.constant 0 : i32
    return %arg0, %c0_i32, %c0_i32_0 : i32, i32, i32
  }
  func.func @transform_1(%arg0: i32) -> (i32, i32, i32) {
    %c1_i32 = arith.constant 1 : i32
    %c0_i32 = arith.constant 0 : i32
    %c0_i32_0 = arith.constant 0 : i32
    return %arg0, %c1_i32, %c0_i32 : i32, i32, i32
  }
  func.func @transform_2(%arg0: i32) -> (i32, i32) {
    %c0_i32 = arith.constant 0 : i32
    %c0_i32_0 = arith.constant 0 : i32
    %c0_i32_1 = arith.constant 0 : i32
    return %c0_i32, %c0_i32_0 : i32, i32
  }
  func.func @transform_3(%arg0: i32) -> (i32, i32) {
    %c0_i32 = arith.constant 0 : i32
    %c0_i32_0 = arith.constant 0 : i32
    %c0_i32_1 = arith.constant 0 : i32
    return %c0_i32, %c0_i32_0 : i32, i32
  }
  func.func @transform_4(%arg0: i32) -> (i32, i32, i32) {
    %c0_i32 = arith.constant 0 : i32
    %c0_i32_0 = arith.constant 0 : i32
    %c0_i32_1 = arith.constant 0 : i32
    return %arg0, %c0_i32, %c0_i32_0 : i32, i32, i32
  }
}

module attributes {stable_mosaic.version = 11 : i64} {
  func.func @_conv1_skip_kernel(%arg0: i32, %arg1: memref<1x8x324xf32, #tpu.memory_space<vmem>>, %arg2: memref<1x324xf32, #tpu.memory_space<vmem>>, %arg3: memref<16x72xf32, #tpu.memory_space<vmem>>, %arg4: memref<1x16x324xf32, #tpu.memory_space<vmem>>, %arg5: memref<1x8x2xf32, #tpu.memory_space<vmem>>, %arg6: memref<72x324xf32, #tpu.memory_space<vmem>>) attributes {dimension_semantics = [#tpu.dimension_semantics<parallel>], iteration_bounds = array<i64: 2>, scalar_prefetch = 0 : i64, scratch_operands = 1 : i64, tpu.core_type = #tpu.core_type<tc>, window_params = [{transform_indices = @transform_0, window_bounds = array<i64: 1, 8, 324>}, {pipeline_mode = #tpu.pipeline_mode<synchronous>, transform_indices = @transform_1, window_bounds = array<i64: 1, 324>}, {pipeline_mode = #tpu.pipeline_mode<synchronous>, transform_indices = @transform_2, window_bounds = array<i64: 16, 72>}, {transform_indices = @transform_3, window_bounds = array<i64: 1, 16, 324>}, {transform_indices = @transform_4, window_bounds = array<i64: 1, 8, 2>}]} {
    %cst = arith.constant 0.000000e+00 : f32
    %0 = vector.broadcast %cst : f32 to vector<72x324xf32>
    %c0 = arith.constant 0 : index
    %c0_0 = arith.constant 0 : index
    %1 = vector.load %arg6[%c0, %c0_0] : memref<72x324xf32, #tpu.memory_space<vmem>>, vector<72x324xf32>
    tpu.vector_store %arg6[%c0, %c0_0], %0 {strides = array<i32>} : memref<72x324xf32, #tpu.memory_space<vmem>>, vector<72x324xf32>,
    %c0_1 = arith.constant 0 : index
    %c0_2 = arith.constant 0 : index
    %c0_3 = arith.constant 0 : index
    %2 = vector.load %arg1[%c0_1, %c0_2, %c0_3] : memref<1x8x324xf32, #tpu.memory_space<vmem>>, vector<1x8x305xf32>
    %3 = vector.shape_cast %2 : vector<1x8x305xf32> to vector<8x305xf32>
    %c0_4 = arith.constant 0 : index
    %c19 = arith.constant 19 : index
    %4 = vector.load %arg6[%c0_4, %c19] : memref<72x324xf32, #tpu.memory_space<vmem>>, vector<8x305xf32>
    tpu.vector_store %arg6[%c0_4, %c19], %3 {strides = array<i32>} : memref<72x324xf32, #tpu.memory_space<vmem>>, vector<8x305xf32>,
    %c0_5 = arith.constant 0 : index
    %c0_6 = arith.constant 0 : index
    %c0_7 = arith.constant 0 : index
    %5 = vector.load %arg1[%c0_5, %c0_6, %c0_7] : memref<1x8x324xf32, #tpu.memory_space<vmem>>, vector<1x8x306xf32>
    %6 = vector.shape_cast %5 : vector<1x8x306xf32> to vector<8x306xf32>
    %c8 = arith.constant 8 : index
    %c18 = arith.constant 18 : index
    %7 = vector.load %arg6[%c8, %c18] : memref<72x324xf32, #tpu.memory_space<vmem>>, vector<8x306xf32>
    tpu.vector_store %arg6[%c8, %c18], %6 {strides = array<i32>} : memref<72x324xf32, #tpu.memory_space<vmem>>, vector<8x306xf32>,
    %c0_8 = arith.constant 0 : index
    %c0_9 = arith.constant 0 : index
    %c0_10 = arith.constant 0 : index
    %8 = vector.load %arg1[%c0_8, %c0_9, %c0_10] : memref<1x8x324xf32, #tpu.memory_space<vmem>>, vector<1x8x307xf32>
    %9 = vector.shape_cast %8 : vector<1x8x307xf32> to vector<8x307xf32>
    %c16 = arith.constant 16 : index
    %c17 = arith.constant 17 : index
    %10 = vector.load %arg6[%c16, %c17] : memref<72x324xf32, #tpu.memory_space<vmem>>, vector<8x307xf32>
    tpu.vector_store %arg6[%c16, %c17], %9 {strides = array<i32>} : memref<72x324xf32, #tpu.memory_space<vmem>>, vector<8x307xf32>,
    %c0_11 = arith.constant 0 : index
    %c0_12 = arith.constant 0 : index
    %c0_13 = arith.constant 0 : index
    %11 = vector.load %arg1[%c0_11, %c0_12, %c0_13] : memref<1x8x324xf32, #tpu.memory_space<vmem>>, vector<1x8x323xf32>
    %12 = vector.shape_cast %11 : vector<1x8x323xf32> to vector<8x323xf32>
    %c24 = arith.constant 24 : index
    %c1 = arith.constant 1 : index
    %13 = vector.load %arg6[%c24, %c1] : memref<72x324xf32, #tpu.memory_space<vmem>>, vector<8x323xf32>
    tpu.vector_store %arg6[%c24, %c1], %12 {strides = array<i32>} : memref<72x324xf32, #tpu.memory_space<vmem>>, vector<8x323xf32>,
    %c0_14 = arith.constant 0 : index
    %c0_15 = arith.constant 0 : index
    %c0_16 = arith.constant 0 : index
    %14 = vector.load %arg1[%c0_14, %c0_15, %c0_16] : memref<1x8x324xf32, #tpu.memory_space<vmem>>, vector<1x8x324xf32>
    %15 = vector.shape_cast %14 : vector<1x8x324xf32> to vector<8x324xf32>
    %c32 = arith.constant 32 : index
    %c0_17 = arith.constant 0 : index
    %16 = vector.load %arg6[%c32, %c0_17] : memref<72x324xf32, #tpu.memory_space<vmem>>, vector<8x324xf32>
    tpu.vector_store %arg6[%c32, %c0_17], %15 {strides = array<i32>} : memref<72x324xf32, #tpu.memory_space<vmem>>, vector<8x324xf32>,
    %c0_18 = arith.constant 0 : index
    %c0_19 = arith.constant 0 : index
    %c1_20 = arith.constant 1 : index
    %17 = vector.load %arg1[%c0_18, %c0_19, %c1_20] : memref<1x8x324xf32, #tpu.memory_space<vmem>>, vector<1x8x323xf32>
    %18 = vector.shape_cast %17 : vector<1x8x323xf32> to vector<8x323xf32>
    %c40 = arith.constant 40 : index
    %c0_21 = arith.constant 0 : index
    %19 = vector.load %arg6[%c40, %c0_21] : memref<72x324xf32, #tpu.memory_space<vmem>>, vector<8x323xf32>
    tpu.vector_store %arg6[%c40, %c0_21], %18 {strides = array<i32>} : memref<72x324xf32, #tpu.memory_space<vmem>>, vector<8x323xf32>,
    %c0_22 = arith.constant 0 : index
    %c0_23 = arith.constant 0 : index
    %c17_24 = arith.constant 17 : index
    %20 = vector.load %arg1[%c0_22, %c0_23, %c17_24] : memref<1x8x324xf32, #tpu.memory_space<vmem>>, vector<1x8x307xf32>
    %21 = vector.shape_cast %20 : vector<1x8x307xf32> to vector<8x307xf32>
    %c48 = arith.constant 48 : index
    %c0_25 = arith.constant 0 : index
    %22 = vector.load %arg6[%c48, %c0_25] : memref<72x324xf32, #tpu.memory_space<vmem>>, vector<8x307xf32>
    tpu.vector_store %arg6[%c48, %c0_25], %21 {strides = array<i32>} : memref<72x324xf32, #tpu.memory_space<vmem>>, vector<8x307xf32>,
    %c0_26 = arith.constant 0 : index
    %c0_27 = arith.constant 0 : index
    %c18_28 = arith.constant 18 : index
    %23 = vector.load %arg1[%c0_26, %c0_27, %c18_28] : memref<1x8x324xf32, #tpu.memory_space<vmem>>, vector<1x8x306xf32>
    %24 = vector.shape_cast %23 : vector<1x8x306xf32> to vector<8x306xf32>
    %c56 = arith.constant 56 : index
    %c0_29 = arith.constant 0 : index
    %25 = vector.load %arg6[%c56, %c0_29] : memref<72x324xf32, #tpu.memory_space<vmem>>, vector<8x306xf32>
    tpu.vector_store %arg6[%c56, %c0_29], %24 {strides = array<i32>} : memref<72x324xf32, #tpu.memory_space<vmem>>, vector<8x306xf32>,
    %c0_30 = arith.constant 0 : index
    %c0_31 = arith.constant 0 : index
    %c19_32 = arith.constant 19 : index
    %26 = vector.load %arg1[%c0_30, %c0_31, %c19_32] : memref<1x8x324xf32, #tpu.memory_space<vmem>>, vector<1x8x305xf32>
    %27 = vector.shape_cast %26 : vector<1x8x305xf32> to vector<8x305xf32>
    %c64 = arith.constant 64 : index
    %c0_33 = arith.constant 0 : index
    %28 = vector.load %arg6[%c64, %c0_33] : memref<72x324xf32, #tpu.memory_space<vmem>>, vector<8x305xf32>
    tpu.vector_store %arg6[%c64, %c0_33], %27 {strides = array<i32>} : memref<72x324xf32, #tpu.memory_space<vmem>>, vector<8x305xf32>,
    %c0_34 = arith.constant 0 : index
    %c0_35 = arith.constant 0 : index
    %29 = vector.load %arg3[%c0_34, %c0_35] : memref<16x72xf32, #tpu.memory_space<vmem>>, vector<16x72xf32>
    %c0_36 = arith.constant 0 : index
    %c0_37 = arith.constant 0 : index
    %30 = vector.load %arg6[%c0_36, %c0_37] : memref<72x324xf32, #tpu.memory_space<vmem>>, vector<72x324xf32>
    %cst_38 = arith.constant dense<0.000000e+00> : vector<16x324xf32>
    %31 = tpu.matmul %29, %30, %cst_38 {dimension_numbers = #tpu.dot_dimension_numbers<[1], [0], [0], [1], [0, 0, 1, 1], [], []>} : vector<16x72xf32>, vector<72x324xf32>, vector<16x324xf32> -> vector<16x324xf32>
    %c0_39 = arith.constant 0 : index
    %c0_40 = arith.constant 0 : index
    %c0_41 = arith.constant 0 : index
    %32 = vector.load %arg4[%c0_39, %c0_40, %c0_41] : memref<1x16x324xf32, #tpu.memory_space<vmem>>, vector<1x16x324xf32>
    %33 = vector.shape_cast %32 : vector<1x16x324xf32> to vector<16x324xf32>
    %34 = vector.shape_cast %31 : vector<16x324xf32> to vector<1x16x324xf32>
    tpu.vector_store %arg4[%c0_39, %c0_40, %c0_41], %34 {strides = array<i32>} : memref<1x16x324xf32, #tpu.memory_space<vmem>>, vector<1x16x324xf32>,
    %35 = vector.extract_strided_slice %31 {offsets = [0, 0], sizes = [8, 324], strides = [1, 1]} : vector<16x324xf32> to vector<8x324xf32>
    %c0_42 = arith.constant 0 : index
    %c0_43 = arith.constant 0 : index
    %36 = vector.load %arg2[%c0_42, %c0_43] : memref<1x324xf32, #tpu.memory_space<vmem>>, vector<1x324xf32>
    %37 = vector.broadcast %36 : vector<1x324xf32> to vector<8x324xf32>
    %38 = arith.mulf %35, %37 : vector<8x324xf32>
    %cst_44 = arith.constant dense<0.000000e+00> : vector<8xf32>
    %39 = vector.multi_reduction <add>, %38, %cst_44 [1] : vector<8x324xf32> to vector<8xf32>
    %40 = vector.shape_cast %39 : vector<8xf32> to vector<8x1xf32>
    %c0_45 = arith.constant 0 : index
    %c0_46 = arith.constant 0 : index
    %c0_47 = arith.constant 0 : index
    %41 = vector.load %arg5[%c0_45, %c0_46, %c0_47] : memref<1x8x2xf32, #tpu.memory_space<vmem>>, vector<1x8x1xf32>
    %42 = vector.shape_cast %41 : vector<1x8x1xf32> to vector<8x1xf32>
    %43 = vector.shape_cast %40 : vector<8x1xf32> to vector<1x8x1xf32>
    tpu.vector_store %arg5[%c0_45, %c0_46, %c0_47], %43 {strides = array<i32>} : memref<1x8x2xf32, #tpu.memory_space<vmem>>, vector<1x8x1xf32>,
    %44 = arith.mulf %38, %38 : vector<8x324xf32>
    %cst_48 = arith.constant dense<0.000000e+00> : vector<8xf32>
    %45 = vector.multi_reduction <add>, %44, %cst_48 [1] : vector<8x324xf32> to vector<8xf32>
    %46 = vector.shape_cast %45 : vector<8xf32> to vector<8x1xf32>
    %c0_49 = arith.constant 0 : index
    %c0_50 = arith.constant 0 : index
    %c1_51 = arith.constant 1 : index
    %47 = vector.load %arg5[%c0_49, %c0_50, %c1_51] : memref<1x8x2xf32, #tpu.memory_space<vmem>>, vector<1x8x1xf32>
    %48 = vector.shape_cast %47 : vector<1x8x1xf32> to vector<8x1xf32>
    %49 = vector.shape_cast %46 : vector<8x1xf32> to vector<1x8x1xf32>
    tpu.vector_store %arg5[%c0_49, %c0_50, %c1_51], %49 {strides = array<i32>} : memref<1x8x2xf32, #tpu.memory_space<vmem>>, vector<1x8x1xf32>,
    return
  }
  func.func @transform_0(%arg0: i32) -> (i32, i32, i32) {
    %c0_i32 = arith.constant 0 : i32
    %c0_i32_0 = arith.constant 0 : i32
    %c0_i32_1 = arith.constant 0 : i32
    return %arg0, %c0_i32, %c0_i32_0 : i32, i32, i32
  }
  func.func @transform_1(%arg0: i32) -> (i32, i32) {
    %c0_i32 = arith.constant 0 : i32
    %c0_i32_0 = arith.constant 0 : i32
    %c0_i32_1 = arith.constant 0 : i32
    return %c0_i32, %c0_i32_0 : i32, i32
  }
  func.func @transform_2(%arg0: i32) -> (i32, i32) {
    %c0_i32 = arith.constant 0 : i32
    %c0_i32_0 = arith.constant 0 : i32
    %c0_i32_1 = arith.constant 0 : i32
    return %c0_i32, %c0_i32_0 : i32, i32
  }
  func.func @transform_3(%arg0: i32) -> (i32, i32, i32) {
    %c0_i32 = arith.constant 0 : i32
    %c0_i32_0 = arith.constant 0 : i32
    %c0_i32_1 = arith.constant 0 : i32
    return %arg0, %c0_i32, %c0_i32_0 : i32, i32, i32
  }
  func.func @transform_4(%arg0: i32) -> (i32, i32, i32) {
    %c0_i32 = arith.constant 0 : i32
    %c0_i32_0 = arith.constant 0 : i32
    %c0_i32_1 = arith.constant 0 : i32
    return %arg0, %c0_i32, %c0_i32_0 : i32, i32, i32
  }
}

module attributes {stable_mosaic.version = 11 : i64} {
  func.func @_bn1_conv2_kernel(%arg0: i32, %arg1: memref<1x8x324xf32, #tpu.memory_space<vmem>>, %arg2: memref<1x324xf32, #tpu.memory_space<vmem>>, %arg3: memref<8x1xf32, #tpu.memory_space<vmem>>, %arg4: memref<8x1xf32, #tpu.memory_space<vmem>>, %arg5: memref<8x72xf32, #tpu.memory_space<vmem>>, %arg6: memref<1x8x324xf32, #tpu.memory_space<vmem>>, %arg7: memref<1x8x2xf32, #tpu.memory_space<vmem>>, %arg8: memref<72x324xf32, #tpu.memory_space<vmem>>) attributes {dimension_semantics = [#tpu.dimension_semantics<parallel>], iteration_bounds = array<i64: 2>, scalar_prefetch = 0 : i64, scratch_operands = 1 : i64, tpu.core_type = #tpu.core_type<tc>, window_params = [{transform_indices = @transform_0, window_bounds = array<i64: 1, 8, 324>}, {pipeline_mode = #tpu.pipeline_mode<synchronous>, transform_indices = @transform_1, window_bounds = array<i64: 1, 324>}, {pipeline_mode = #tpu.pipeline_mode<synchronous>, transform_indices = @transform_2, window_bounds = array<i64: 8, 1>}, {pipeline_mode = #tpu.pipeline_mode<synchronous>, transform_indices = @transform_3, window_bounds = array<i64: 8, 1>}, {pipeline_mode = #tpu.pipeline_mode<synchronous>, transform_indices = @transform_4, window_bounds = array<i64: 8, 72>}, {transform_indices = @transform_5, window_bounds = array<i64: 1, 8, 324>}, {transform_indices = @transform_6, window_bounds = array<i64: 1, 8, 2>}]} {
    %c0 = arith.constant 0 : index
    %c0_0 = arith.constant 0 : index
    %0 = vector.load %arg3[%c0, %c0_0] : memref<8x1xf32, #tpu.memory_space<vmem>>, vector<8x1xf32>
    %c0_1 = arith.constant 0 : index
    %c0_2 = arith.constant 0 : index
    %c0_3 = arith.constant 0 : index
    %1 = vector.load %arg1[%c0_1, %c0_2, %c0_3] : memref<1x8x324xf32, #tpu.memory_space<vmem>>, vector<1x8x324xf32>
    %2 = vector.shape_cast %1 : vector<1x8x324xf32> to vector<8x324xf32>
    %3 = vector.broadcast %0 : vector<8x1xf32> to vector<8x324xf32>
    %4 = arith.mulf %3, %2 : vector<8x324xf32>
    %c0_4 = arith.constant 0 : index
    %c0_5 = arith.constant 0 : index
    %5 = vector.load %arg4[%c0_4, %c0_5] : memref<8x1xf32, #tpu.memory_space<vmem>>, vector<8x1xf32>
    %6 = vector.broadcast %5 : vector<8x1xf32> to vector<8x324xf32>
    %7 = arith.addf %4, %6 : vector<8x324xf32>
    %cst = arith.constant 0.000000e+00 : f32
    %8 = vector.broadcast %cst : f32 to vector<8x324xf32>
    %9 = arith.maximumf %7, %8 : vector<8x324xf32>
    %c0_6 = arith.constant 0 : index
    %c0_7 = arith.constant 0 : index
    %10 = vector.load %arg2[%c0_6, %c0_7] : memref<1x324xf32, #tpu.memory_space<vmem>>, vector<1x324xf32>
    %11 = vector.broadcast %10 : vector<1x324xf32> to vector<8x324xf32>
    %12 = arith.mulf %9, %11 : vector<8x324xf32>
    %cst_8 = arith.constant 0.000000e+00 : f32
    %13 = vector.broadcast %cst_8 : f32 to vector<72x324xf32>
    %c0_9 = arith.constant 0 : index
    %c0_10 = arith.constant 0 : index
    %14 = vector.load %arg8[%c0_9, %c0_10] : memref<72x324xf32, #tpu.memory_space<vmem>>, vector<72x324xf32>
    tpu.vector_store %arg8[%c0_9, %c0_10], %13 {strides = array<i32>} : memref<72x324xf32, #tpu.memory_space<vmem>>, vector<72x324xf32>,
    %15 = vector.extract_strided_slice %12 {offsets = [0, 0], sizes = [8, 305], strides = [1, 1]} : vector<8x324xf32> to vector<8x305xf32>
    %c0_11 = arith.constant 0 : index
    %c19 = arith.constant 19 : index
    %16 = vector.load %arg8[%c0_11, %c19] : memref<72x324xf32, #tpu.memory_space<vmem>>, vector<8x305xf32>
    tpu.vector_store %arg8[%c0_11, %c19], %15 {strides = array<i32>} : memref<72x324xf32, #tpu.memory_space<vmem>>, vector<8x305xf32>,
    %17 = vector.extract_strided_slice %12 {offsets = [0, 0], sizes = [8, 306], strides = [1, 1]} : vector<8x324xf32> to vector<8x306xf32>
    %c8 = arith.constant 8 : index
    %c18 = arith.constant 18 : index
    %18 = vector.load %arg8[%c8, %c18] : memref<72x324xf32, #tpu.memory_space<vmem>>, vector<8x306xf32>
    tpu.vector_store %arg8[%c8, %c18], %17 {strides = array<i32>} : memref<72x324xf32, #tpu.memory_space<vmem>>, vector<8x306xf32>,
    %19 = vector.extract_strided_slice %12 {offsets = [0, 0], sizes = [8, 307], strides = [1, 1]} : vector<8x324xf32> to vector<8x307xf32>
    %c16 = arith.constant 16 : index
    %c17 = arith.constant 17 : index
    %20 = vector.load %arg8[%c16, %c17] : memref<72x324xf32, #tpu.memory_space<vmem>>, vector<8x307xf32>
    tpu.vector_store %arg8[%c16, %c17], %19 {strides = array<i32>} : memref<72x324xf32, #tpu.memory_space<vmem>>, vector<8x307xf32>,
    %21 = vector.extract_strided_slice %12 {offsets = [0, 0], sizes = [8, 323], strides = [1, 1]} : vector<8x324xf32> to vector<8x323xf32>
    %c24 = arith.constant 24 : index
    %c1 = arith.constant 1 : index
    %22 = vector.load %arg8[%c24, %c1] : memref<72x324xf32, #tpu.memory_space<vmem>>, vector<8x323xf32>
    tpu.vector_store %arg8[%c24, %c1], %21 {strides = array<i32>} : memref<72x324xf32, #tpu.memory_space<vmem>>, vector<8x323xf32>,
    %c32 = arith.constant 32 : index
    %c0_12 = arith.constant 0 : index
    %23 = vector.load %arg8[%c32, %c0_12] : memref<72x324xf32, #tpu.memory_space<vmem>>, vector<8x324xf32>
    tpu.vector_store %arg8[%c32, %c0_12], %12 {strides = array<i32>} : memref<72x324xf32, #tpu.memory_space<vmem>>, vector<8x324xf32>,
    %24 = vector.extract_strided_slice %12 {offsets = [0, 1], sizes = [8, 323], strides = [1, 1]} : vector<8x324xf32> to vector<8x323xf32>
    %c40 = arith.constant 40 : index
    %c0_13 = arith.constant 0 : index
    %25 = vector.load %arg8[%c40, %c0_13] : memref<72x324xf32, #tpu.memory_space<vmem>>, vector<8x323xf32>
    tpu.vector_store %arg8[%c40, %c0_13], %24 {strides = array<i32>} : memref<72x324xf32, #tpu.memory_space<vmem>>, vector<8x323xf32>,
    %26 = vector.extract_strided_slice %12 {offsets = [0, 17], sizes = [8, 307], strides = [1, 1]} : vector<8x324xf32> to vector<8x307xf32>
    %c48 = arith.constant 48 : index
    %c0_14 = arith.constant 0 : index
    %27 = vector.load %arg8[%c48, %c0_14] : memref<72x324xf32, #tpu.memory_space<vmem>>, vector<8x307xf32>
    tpu.vector_store %arg8[%c48, %c0_14], %26 {strides = array<i32>} : memref<72x324xf32, #tpu.memory_space<vmem>>, vector<8x307xf32>,
    %28 = vector.extract_strided_slice %12 {offsets = [0, 18], sizes = [8, 306], strides = [1, 1]} : vector<8x324xf32> to vector<8x306xf32>
    %c56 = arith.constant 56 : index
    %c0_15 = arith.constant 0 : index
    %29 = vector.load %arg8[%c56, %c0_15] : memref<72x324xf32, #tpu.memory_space<vmem>>, vector<8x306xf32>
    tpu.vector_store %arg8[%c56, %c0_15], %28 {strides = array<i32>} : memref<72x324xf32, #tpu.memory_space<vmem>>, vector<8x306xf32>,
    %30 = vector.extract_strided_slice %12 {offsets = [0, 19], sizes = [8, 305], strides = [1, 1]} : vector<8x324xf32> to vector<8x305xf32>
    %c64 = arith.constant 64 : index
    %c0_16 = arith.constant 0 : index
    %31 = vector.load %arg8[%c64, %c0_16] : memref<72x324xf32, #tpu.memory_space<vmem>>, vector<8x305xf32>
    tpu.vector_store %arg8[%c64, %c0_16], %30 {strides = array<i32>} : memref<72x324xf32, #tpu.memory_space<vmem>>, vector<8x305xf32>,
    %c0_17 = arith.constant 0 : index
    %c0_18 = arith.constant 0 : index
    %32 = vector.load %arg5[%c0_17, %c0_18] : memref<8x72xf32, #tpu.memory_space<vmem>>, vector<8x72xf32>
    %c0_19 = arith.constant 0 : index
    %c0_20 = arith.constant 0 : index
    %33 = vector.load %arg8[%c0_19, %c0_20] : memref<72x324xf32, #tpu.memory_space<vmem>>, vector<72x324xf32>
    %cst_21 = arith.constant dense<0.000000e+00> : vector<8x324xf32>
    %34 = tpu.matmul %32, %33, %cst_21 {dimension_numbers = #tpu.dot_dimension_numbers<[1], [0], [0], [1], [0, 0, 1, 1], [], []>} : vector<8x72xf32>, vector<72x324xf32>, vector<8x324xf32> -> vector<8x324xf32>
    %c0_22 = arith.constant 0 : index
    %c0_23 = arith.constant 0 : index
    %c0_24 = arith.constant 0 : index
    %35 = vector.load %arg6[%c0_22, %c0_23, %c0_24] : memref<1x8x324xf32, #tpu.memory_space<vmem>>, vector<1x8x324xf32>
    %36 = vector.shape_cast %35 : vector<1x8x324xf32> to vector<8x324xf32>
    %37 = vector.shape_cast %34 : vector<8x324xf32> to vector<1x8x324xf32>
    tpu.vector_store %arg6[%c0_22, %c0_23, %c0_24], %37 {strides = array<i32>} : memref<1x8x324xf32, #tpu.memory_space<vmem>>, vector<1x8x324xf32>,
    %c0_25 = arith.constant 0 : index
    %c0_26 = arith.constant 0 : index
    %38 = vector.load %arg2[%c0_25, %c0_26] : memref<1x324xf32, #tpu.memory_space<vmem>>, vector<1x324xf32>
    %39 = vector.broadcast %38 : vector<1x324xf32> to vector<8x324xf32>
    %40 = arith.mulf %34, %39 : vector<8x324xf32>
    %cst_27 = arith.constant dense<0.000000e+00> : vector<8xf32>
    %41 = vector.multi_reduction <add>, %40, %cst_27 [1] : vector<8x324xf32> to vector<8xf32>
    %42 = vector.shape_cast %41 : vector<8xf32> to vector<8x1xf32>
    %c0_28 = arith.constant 0 : index
    %c0_29 = arith.constant 0 : index
    %c0_30 = arith.constant 0 : index
    %43 = vector.load %arg7[%c0_28, %c0_29, %c0_30] : memref<1x8x2xf32, #tpu.memory_space<vmem>>, vector<1x8x1xf32>
    %44 = vector.shape_cast %43 : vector<1x8x1xf32> to vector<8x1xf32>
    %45 = vector.shape_cast %42 : vector<8x1xf32> to vector<1x8x1xf32>
    tpu.vector_store %arg7[%c0_28, %c0_29, %c0_30], %45 {strides = array<i32>} : memref<1x8x2xf32, #tpu.memory_space<vmem>>, vector<1x8x1xf32>,
    %46 = arith.mulf %40, %40 : vector<8x324xf32>
    %cst_31 = arith.constant dense<0.000000e+00> : vector<8xf32>
    %47 = vector.multi_reduction <add>, %46, %cst_31 [1] : vector<8x324xf32> to vector<8xf32>
    %48 = vector.shape_cast %47 : vector<8xf32> to vector<8x1xf32>
    %c0_32 = arith.constant 0 : index
    %c0_33 = arith.constant 0 : index
    %c1_34 = arith.constant 1 : index
    %49 = vector.load %arg7[%c0_32, %c0_33, %c1_34] : memref<1x8x2xf32, #tpu.memory_space<vmem>>, vector<1x8x1xf32>
    %50 = vector.shape_cast %49 : vector<1x8x1xf32> to vector<8x1xf32>
    %51 = vector.shape_cast %48 : vector<8x1xf32> to vector<1x8x1xf32>
    tpu.vector_store %arg7[%c0_32, %c0_33, %c1_34], %51 {strides = array<i32>} : memref<1x8x2xf32, #tpu.memory_space<vmem>>, vector<1x8x1xf32>,
    return
  }
  func.func @transform_0(%arg0: i32) -> (i32, i32, i32) {
    %c0_i32 = arith.constant 0 : i32
    %c0_i32_0 = arith.constant 0 : i32
    %c0_i32_1 = arith.constant 0 : i32
    return %arg0, %c0_i32, %c0_i32_0 : i32, i32, i32
  }
  func.func @transform_1(%arg0: i32) -> (i32, i32) {
    %c0_i32 = arith.constant 0 : i32
    %c0_i32_0 = arith.constant 0 : i32
    %c0_i32_1 = arith.constant 0 : i32
    return %c0_i32, %c0_i32_0 : i32, i32
  }
  func.func @transform_2(%arg0: i32) -> (i32, i32) {
    %c0_i32 = arith.constant 0 : i32
    %c0_i32_0 = arith.constant 0 : i32
    %c0_i32_1 = arith.constant 0 : i32
    return %c0_i32, %c0_i32_0 : i32, i32
  }
  func.func @transform_3(%arg0: i32) -> (i32, i32) {
    %c0_i32 = arith.constant 0 : i32
    %c0_i32_0 = arith.constant 0 : i32
    %c0_i32_1 = arith.constant 0 : i32
    return %c0_i32, %c0_i32_0 : i32, i32
  }
  func.func @transform_4(%arg0: i32) -> (i32, i32) {
    %c0_i32 = arith.constant 0 : i32
    %c0_i32_0 = arith.constant 0 : i32
    %c0_i32_1 = arith.constant 0 : i32
    return %c0_i32, %c0_i32_0 : i32, i32
  }
  func.func @transform_5(%arg0: i32) -> (i32, i32, i32) {
    %c0_i32 = arith.constant 0 : i32
    %c0_i32_0 = arith.constant 0 : i32
    %c0_i32_1 = arith.constant 0 : i32
    return %arg0, %c0_i32, %c0_i32_0 : i32, i32, i32
  }
  func.func @transform_6(%arg0: i32) -> (i32, i32, i32) {
    %c0_i32 = arith.constant 0 : i32
    %c0_i32_0 = arith.constant 0 : i32
    %c0_i32_1 = arith.constant 0 : i32
    return %arg0, %c0_i32, %c0_i32_0 : i32, i32, i32
  }
}

</mosaic_0001>

<bundles_post_ra>
// kernel: residual_conv.5
= control target key start
LH: loop header
LB: loop body
LE: loop exit
PB: predicated region body
PF: predicated region fallthrough
CT: control target
= control target key end

     0   :  { %s386_s15 = smov 0   ;;  %s412_s0 = inlined_call_operand.vmem [shape: f32[2,8,324], index: 0, kind: input, shape index: {}]   ;;  %s413_s1 = inlined_call_operand.vmem [shape: f32[2,16,324], index: 1, kind: input, shape index: {}]   ;;  %s414_s2 = inlined_call_operand.vmem [shape: f32[8,1], index: 2, kind: input, shape index: {}]   ;;  %s415_s3 = inlined_call_operand.vmem [shape: f32[8,1], index: 3, kind: input, shape index: {}]   ;;  %s416_s4 = inlined_call_operand.vmem [shape: f32[2,8,324], index: 4, kind: output, shape index: {}]  }
   0x1 LB: > { %s328_s16 = sadd.s32 4294967295, %s358_s15   ;;  %p332_p0 = scmp.ge.s32.totalorder %s358_s15, 1  ;;  %s358_s15 = sphi %s386_s15, %s14_s15  }
   0x2   : > { %p173_p1 = scmp.lt.s32.totalorder %s358_s15, 3 }
   0x4   : > { %p174_p2 = pnand %p332_p0, %p173_p1 }
   0x5   : > { %p205_p3 = scmp.lt.s32.totalorder (!%p174_p2), %s328_s16, 1 }
   0x6   : > { %177 = sbr.rel (%p174_p2) target bundleno = 145 (0x91), region = 36 }
   0xb   : > { %v221_v0 = vld [vmem:[%s414_s2] sm:$0xff]  ;;  %v360_v1 = vmov 0   ;;  %s418_s16 = smov (!%p205_p3, %s328_s16), 1  ;;  %vm253_vm0 = vcmask 556032  }
   0xc   : > { %351 = vset.pattern.permute.xlu0 %v360_v1  ;;  %v233_v2 = vld [vmem:[%s415_s3] sm:$0xff]  ;;  %s341_s21 = smul.u32 24, %s418_s16 }
   0xd   : > { %227 = vperm.xlu0 %351, %v221_v0   ;;  %s334_s25 = smul.u32 48, %s418_s16 }
   0xe   : > { %s209_s24 = scalar_lea.vmem %s412_s0, %s341_s21  ;;  %s220_s5 = scalar_lea.vmem %s416_s4, %s341_s21 }
   0xf   : > { %v222_v4 = vld [vmem:[%s209_s24] sm:$0xff]  ;;  %v223_v5 = vld [vmem:[%s209_s24 + $0x8] sm:$0xff]  ;;  %v224_v6 = vld [vmem:[%s209_s24 + $0x10] sm:$0xff]  ;;  %s294_s28 = scalar_lea.vmem %s413_s1, %s334_s25 }
  0x10   : > { %v336_v11 = vld [vmem:[%s294_s28 + $0x18] sm:$0xff]  ;;  %v337_v12 = vld [vmem:[%s294_s28 + $0x20] sm:$0xff]  ;;  %v338_v13 = vld [vmem:[%s294_s28 + $0x28] sm:$0xff] }
  0x15   : > { %236 = vperm.xlu0 %351, %v233_v2  }
  0x7f   : > { %v228_v3 = vpop.permute.xlu0 %227 }
  0x80   : > { %v230_v7 = vmul.f32 %v228_v3, %v222_v4  ;;  %v231_v8 = vmul.f32 %v228_v3, %v223_v5  ;;  %v232_v9 = vmul.f32 %v228_v3, %v224_v6 }
  0x87   : > { %v237_v10 = vpop.permute.xlu0 %236 }
  0x88   : > { %v239_v14 = vadd.f32 %v237_v10, %v230_v7  ;;  %v240_v15 = vadd.f32 %v237_v10, %v231_v8  ;;  %v241_v16 = vadd.f32 %v237_v10, %v232_v9 }
  0x8a   : > { %v245_v17 = vadd.f32 %v336_v11, %v239_v14  ;;  %v246_v18 = vadd.f32 %v337_v12, %v240_v15  ;;  %v247_v19 = vadd.f32 %v338_v13, %v241_v16 }
  0x8c   : > { %v248_v20 = vmax.f32 %v245_v17, 0.0  ;;  %v249_v21 = vmax.f32 %v246_v18, 0.0  ;;  %v250_v22 = vmax.f32 %v247_v19, 0.0 }
  0x8e   : > { %251 = vst [vmem:[%s220_s5] sm:$0xff] %v248_v20 }
  0x8f   : > { %252 = vst [vmem:[%s220_s5 + $0x8] sm:$0xff] %v249_v21 }
  0x90   : > { %254 = vst.msk [vmem:[%s220_s5 + $0x10] sm:$0xff] %vm253_vm0, %v250_v22 }
  0x91 PF: > { %s14_s15 = sadd.s32 1, %s358_s15  }
  0x92   : > { %p11_p4 = scmp.ge.s32.totalorder %s14_s15, 4  }
  0x94   :  { %13 = sbr.rel (!%p11_p4) target bundleno = 1 (0x1), region = 69 }

// kernel: residual_conv.3
= control target key start
LH: loop header
LB: loop body
LE: loop exit
PB: predicated region body
PF: predicated region fallthrough
CT: control target
= control target key end

     0   :  { %s729_s15 = smov 0   ;;  %s821_s0 = inlined_call_operand.vmem [shape: f32[2,8,324], index: 0, kind: input, shape index: {}]   ;;  %s822_s1 = inlined_call_operand.vmem [shape: f32[1,324], index: 1, kind: input, shape index: {}]   ;;  %s823_s2 = inlined_call_operand.vmem [shape: f32[16,72], index: 2, kind: input, shape index: {}]   ;;  %s824_s3 = inlined_call_operand.vmem [shape: f32[2,16,324], index: 3, kind: output, shape index: {0}]   ;;  %s825_s4 = inlined_call_operand.vmem [shape: f32[2,8,2], index: 4, kind: output, shape index: {1}]  }
   0x1 LB: > { %s643_s16 = sadd.s32 4294967295, %s693_s15   ;;  %p647_p0 = scmp.ge.s32.totalorder %s693_s15, 1  ;;  %s693_s15 = sphi %s729_s15, %s15_s15  }
   0x2   : > { %p165_p1 = scmp.lt.s32.totalorder %s693_s15, 3 }
   0x4   : > { %p166_p2 = pnand %p647_p0, %p165_p1 }
   0x5   : > { %p195_p3 = scmp.lt.s32.totalorder (!%p166_p2), %s643_s16, 1  ;;  %s695_s21 = smov (!%p166_p2), 109  }
   0x6   : > { %169 = sbr.rel (%p166_p2) target bundleno = 451 (0x1c3), region = 32  ;;  %s696_s22 = smov (!%p166_p2), 111  }
   0x7   : > { %s697_s23 = smov (!%p166_p2), 110   ;;  %s698_s24 = smov (!%p166_p2), 127  }
   0x8   : > { %s699_s25 = smov (!%p166_p2), 1   ;;  %s700_s26 = smov (!%p166_p2), 17  }
   0x9   : > { %s701_s27 = smov (!%p166_p2), 18   ;;  %s702_s28 = smov (!%p166_p2), 19  }
   0xb   : > { %s827_s16 = smov (!%p195_p3, %s643_s16), 1  ;;  %vm211_vm0 = vcmask 556032   ;;  %v703_v3 = vmov 0.0   ;;  %vm351_vm1 = vcmask 547840   ;;  %vm409_vm2 = vcmask 891904   ;;  %v419_v53 = vld [vmem:[%s823_s2] sm:$0xff] }
   0xc   : > { %s668_s17 = smul.u32 24, %s827_s16  ;;  %236 = vst.msk [vmem:[#allocation2 + $0xd0] sm:$0xff] %vm211_vm0, %v703_v3  ;;  %vm417_vm3 = vcmask 400384   ;;  %vm373_vm4 = vcmask 416768   ;;  %vm395_vm5 = vcmask 408576   ;;  %vm387_vm6 = vcmask 900096  }
   0xd   : > { %209 = vst [vmem:[#allocation2] sm:$0xff] %v703_v3  ;;  %vm365_vm7 = vcmask 908288   ;;  %vm315_vm8 = vcmask 7168   ;;  %vm343_vm9 = vcmask 1039360   ;;  %vm255_vm10 = vcmask 1047704   ;;  %v420_v56 = vld [vmem:[%s823_s2 + $0x8] sm:$0xff] }
   0xe   : > { %s199_s20 = scalar_lea.vmem %s821_s0, %s668_s17  ;;  %212 = vst.msk [vmem:[#allocation2 + $0x10] sm:$0xff] %vm211_vm0, %v703_v3  ;;  %vm293_vm11 = vcmask 138240   ;;  %vm271_vm12 = vcmask 146432   ;;  %vm321_vm13 = vcmask 1047560   ;;  %vm249_vm14 = vcmask 154624   ;;  %s669_s7 = smul.u32 48, %s827_s16 }
   0xf   : > { %v399_v0 = vld [vmem:[%s199_s20 + $0x10] sm:$0xff]  ;;  %v743_v1 = vld [vmem:[%s199_s20] sm:$0xff]  ;;  %v745_v2 = vld [vmem:[%s199_s20 + $0x8] sm:$0xff]  ;;  %213 = vst [vmem:[#allocation2 + $0x18] sm:$0xff] %v703_v3  ;;  %vm299_vm15 = vcmask 1047688   ;;  %s650_s13 = sshll.u32 %s827_s16, 3 }
  0x10   : > { %407 = vrot.lane.b32.xlu0 %v399_v0, %s695_s21  ;;  %363 = vrot.lane.b32.xlu1 %v399_v0, %s696_s22  ;;  %215 = vst.msk [vmem:[#allocation2 + $0x28] sm:$0xff] %vm211_vm0, %v703_v3  ;;  %v530_v59 = vld [vmem:[%s822_s1] sm:$0x7]  ;;  %s204_s12 = scalar_lea.vmem %s824_s3, %s669_s7  ;;  %s208_s18 = scalar_lea.vmem %s825_s4, %s650_s13 }
  0x11   : > { %405 = vrot.lane.b32.xlu2 %v745_v2, %s695_s21  ;;  %216 = vst [vmem:[#allocation2 + $0x30] sm:$0xff] %v703_v3  ;;  %v533_v61 = vperm.slane %v530_v59, 1  ;;  %v534_v62 = vperm.slane %v530_v59, 2 }
  0x12   : > { %218 = vst.msk [vmem:[#allocation2 + $0x40] sm:$0xff] %vm211_vm0, %v703_v3 }
  0x13   : > { %219 = vst [vmem:[#allocation2 + $0x48] sm:$0xff] %v703_v3 }
  0x14   : > { %221 = vst.msk [vmem:[#allocation2 + $0x58] sm:$0xff] %vm211_vm0, %v703_v3 }
  0x15   : > { %224 = vst.msk [vmem:[#allocation2 + $0x70] sm:$0xff] %vm211_vm0, %v703_v3 }
  0x16   : > { %227 = vst.msk [vmem:[#allocation2 + $0x88] sm:$0xff] %vm211_vm0, %v703_v3 }
  0x17   : > { %230 = vst.msk [vmem:[#allocation2 + $0xa0] sm:$0xff] %vm211_vm0, %v703_v3 }
  0x18   : > { %385 = vrot.lane.b32.xlu0 %v399_v0, %s697_s23  ;;  %403 = vrot.lane.b32.xlu1 %v743_v1, %s695_s21  ;;  %233 = vst.msk [vmem:[#allocation2 + $0xb8] sm:$0xff] %vm211_vm0, %v703_v3 }
  0x19   : > { %341 = vrot.lane.b32.xlu2 %v399_v0, %s698_s24  ;;  %330 = vst.msk [vmem:[#allocation2 + $0x70] sm:$0xff] %vm211_vm0, %v399_v0 }
  0x20   : > { %381 = vrot.lane.b32.xlu0 %v743_v1, %s697_s23  ;;  %383 = vrot.lane.b32.xlu1 %v745_v2, %s697_s23  ;;  %v435_v24 = vld [vmem:[#allocation2 + $0x70] sm:$0xff] }
  0x21   : > { %359 = vrot.lane.b32.xlu2 %v743_v1, %s696_s22 }
  0x28   : > { %361 = vrot.lane.b32.xlu0 %v745_v2, %s696_s22  ;;  %311 = vrot.lane.b32.xlu1 %v745_v2, %s699_s25 }
  0x29   : > { %313 = vrot.lane.b32.xlu2 %v399_v0, %s699_s25 }
  0x30   : > { %337 = vrot.lane.b32.xlu0 %v743_v1, %s698_s24  ;;  %339 = vrot.lane.b32.xlu1 %v745_v2, %s698_s24 }
  0x31   : > { %289 = vrot.lane.b32.xlu2 %v745_v2, %s700_s26 }
  0x38   : > { %291 = vrot.lane.b32.xlu0 %v399_v0, %s700_s26  ;;  %267 = vrot.lane.b32.xlu1 %v745_v2, %s701_s27 }
  0x39   : > { %269 = vrot.lane.b32.xlu2 %v399_v0, %s701_s27 }
  0x40   : > { %309 = vrot.lane.b32.xlu0 %v743_v1, %s699_s25  ;;  %245 = vrot.lane.b32.xlu1 %v745_v2, %s702_s28 }
  0x41   : > { %247 = vrot.lane.b32.xlu2 %v399_v0, %s702_s28  ;;  %v532_v0 = vperm.slane %v530_v59, 0 }
  0x48   : > { %287 = vrot.lane.b32.xlu0 %v743_v1, %s700_s26  ;;  %265 = vrot.lane.b32.xlu1 %v743_v1, %s701_s27 }
  0x49   : > { %243 = vrot.lane.b32.xlu2 %v743_v1, %s702_s28 }
  0x6b   : > { %v406_v4 = vpop.permute.xlu2 %405 }
  0x73   : > { %v342_v5 = vpop.permute.xlu2 %341 }
  0x74   : > { %352 = vst.msk [vmem:[#allocation2 + $0x88] sm:$0xff] %vm351_vm1, %v342_v5  ;;  %vm277_vm1 = vcmask 1047696  }
  0x7b   : > { %v360_v6 = vpop.permute.xlu2 %359  ;;  %v438_v23 = vld [vmem:[#allocation2 + $0x88] sm:$0xff] }
  0x82   : > { %v408_v7 = vpop.permute.xlu0 %407  ;;  %v364_v8 = vpop.permute.xlu1 %363 }
  0x83   : > { %v411_v9 = vsel %vm409_vm2, %v406_v4, %v408_v7  ;;  %418 = vst.msk [vmem:[#allocation2 + $0xd0] sm:$0xff] %vm417_vm3, %v408_v7  ;;  %v314_v10 = vpop.permute.xlu2 %313  ;;  %vm555_vm3 = vcmask 15368  }
  0x84   : > { %485 = vmatpush.msra.mxu1 %v411_v9  ;;  %374 = vst.msk [vmem:[#allocation2 + $0xa0] sm:$0xff] %vm373_vm4, %v364_v8 }
  0x8a   : > { %v386_v11 = vpop.permute.xlu0 %385  ;;  %v404_v12 = vpop.permute.xlu1 %403  ;;  %v447_v13 = vld [vmem:[#allocation2 + $0xd0] sm:$0xff] }
  0x8b   : > { %396 = vst.msk [vmem:[#allocation2 + $0xb8] sm:$0xff] %vm395_vm5, %v386_v11  ;;  %v410_v14 = vsel %vm409_vm2, %v404_v12, %v406_v4  ;;  %508 = vmatpush.msra.mxu2 %v447_v13  ;;  %v773_v15 = vpop.permute.xlu2 %289  ;;  %v441_v22 = vld [vmem:[#allocation2 + $0xa0] sm:$0xff]  ;;  %vm448_vm2 = vcmask 588800  }
  0x8c   : > { %462 = vmatpush.msra.mxu0 %v410_v14  ;;  %659 = vmatpush.msra.mxu3 %v410_v14 }
  0x92   : > { %v382_v16 = vpop.permute.xlu0 %381  ;;  %v384_v17 = vpop.permute.xlu1 %383  ;;  %v444_v18 = vld [vmem:[#allocation2 + $0xb8] sm:$0xff] }
  0x93   : > { %v388_v19 = vsel %vm387_vm6, %v382_v16, %v384_v17  ;;  %v389_v20 = vsel %vm387_vm6, %v384_v17, %v386_v11  ;;  %509 = vmatpush.msra.mxu2 %v444_v18  ;;  %v270_v21 = vpop.permute.xlu2 %269 }
  0x94   : > { %463 = vmatpush.msra.mxu0 %v388_v19  ;;  %660 = vmatpush.msra.mxu3 %v388_v19 }
  0x95   : > { %510 = vmatpush.msra.mxu2 %v441_v22  ;;  %486 = vmatpush.msra.mxu1 %v389_v20 }
  0x97   : > { %511 = vmatpush.msra.mxu2 %v438_v23 }
  0x99   : > { %512 = vmatpush.msra.mxu2 %v435_v24 }
  0x9a   : > { %v362_v25 = vpop.permute.xlu0 %361  ;;  %v312_v26 = vpop.permute.xlu1 %311 }
  0x9b   : > { %v366_v27 = vsel %vm365_vm7, %v360_v6, %v362_v25  ;;  %v367_v28 = vsel %vm365_vm7, %v362_v25, %v364_v8  ;;  %v317_v29 = vsel %vm315_vm8, %v312_v26, %v314_v10  ;;  %v248_v30 = vpop.permute.xlu2 %247 }
  0x9c   : > { %464 = vmatpush.msra.mxu0 %v366_v27  ;;  %661 = vmatpush.msra.mxu3 %v366_v27  ;;  %324 = vst.msk [vmem:[#allocation2 + $0x58] sm:$0xff] %vm211_vm0, %v317_v29 }
  0x9d   : > { %487 = vmatpush.msra.mxu1 %v367_v28 }
  0xa2   : > { %v338_v31 = vpop.permute.xlu0 %337  ;;  %v340_v32 = vpop.permute.xlu1 %339 }
  0xa3   : > { %v344_v33 = vsel %vm343_vm9, %v338_v31, %v340_v32  ;;  %v345_v34 = vsel %vm343_vm9, %v340_v32, %v342_v5  ;;  %v432_v35 = vld [vmem:[#allocation2 + $0x58] sm:$0xff]  ;;  %v244_v36 = vpop.permute.xlu2 %243 }
  0xa4   : > { %465 = vmatpush.msra.mxu0 %v344_v33  ;;  %662 = vmatpush.msra.mxu3 %v344_v33  ;;  %256 = vst.msk [vmem:[#allocation2] sm:$0xff] %vm255_vm10, %v244_v36 }
  0xa5   : > { %488 = vmatpush.msra.mxu1 %v345_v34  ;;  %513 = vmatpush.msra.mxu2 %v432_v35 }
  0xa6   : > { %466 = vmatpush.msra.mxu0 %v743_v1  ;;  %663 = vmatpush.msra.mxu3 %v743_v1 }
  0xa7   : > { %489 = vmatpush.msra.mxu1 %v745_v2 }
  0xaa   : > { %v292_v37 = vpop.permute.xlu0 %291  ;;  %v268_v38 = vpop.permute.xlu1 %267 }
  0xab   : > { %v295_v39 = vsel %vm293_vm11, %v773_v15, %v292_v37  ;;  %v273_v40 = vsel %vm271_vm12, %v268_v38, %v270_v21  ;;  %v421_v58 = vld [vmem:[#allocation2] sm:$0xff] }
  0xac   : > { %302 = vst.msk [vmem:[#allocation2 + $0x40] sm:$0xff] %vm211_vm0, %v295_v39 }
  0xad   : > { %280 = vst.msk [vmem:[#allocation2 + $0x28] sm:$0xff] %vm211_vm0, %v273_v40 }
  0xb2   : > { %v310_v41 = vpop.permute.xlu0 %309  ;;  %v246_v42 = vpop.permute.xlu1 %245 }
  0xb3   : > { %v316_v43 = vsel %vm315_vm8, %v310_v41, %v312_v26  ;;  %322 = vst.msk [vmem:[#allocation2 + $0x48] sm:$0xff] %vm321_vm13, %v310_v41  ;;  %v251_v44 = vsel %vm249_vm14, %v246_v42, %v248_v30  ;;  %v429_v45 = vld [vmem:[#allocation2 + $0x40] sm:$0xff]  ;;  %v250_v46 = vsel %vm249_vm14, %v244_v36, %v246_v42 }
  0xb4   : > { %514 = vmatpush.msra.mxu2 %v429_v45  ;;  %v426_v47 = vld [vmem:[#allocation2 + $0x28] sm:$0xff]  ;;  %490 = vmatpush.msra.mxu1 %v316_v43  ;;  %258 = vst.msk [vmem:[#allocation2 + $0x10] sm:$0xff] %vm211_vm0, %v251_v44 }
  0xb6   : > { %515 = vmatpush.msra.mxu2 %v426_v47 }
  0xba   : > { %v288_v48 = vpop.permute.xlu0 %287  ;;  %v266_v49 = vpop.permute.xlu1 %265  ;;  %v430_v50 = vld [vmem:[#allocation2 + $0x48] sm:$0xff] }
  0xbb   : > { %v294_v51 = vsel %vm293_vm11, %v288_v48, %v773_v15  ;;  %300 = vst.msk [vmem:[#allocation2 + $0x30] sm:$0xff] %vm299_vm15, %v288_v48  ;;  %v272_v52 = vsel %vm271_vm12, %v266_v49, %v268_v38  ;;  %467 = vmatpush.msra.mxu0 %v430_v50  ;;  %664 = vmatpush.msra.mxu3 %v430_v50  ;;  %v423_v54 = vld [vmem:[#allocation2 + $0x10] sm:$0xff] }
  0xbc   : > { %491 = vmatpush.msra.mxu1 %v294_v51  ;;  %278 = vst.msk [vmem:[#allocation2 + $0x18] sm:$0xff] %vm277_vm1, %v266_v49  ;;  %516 = vmatpush.msra.mxu2 %v423_v54 }
  0xbd   : > { %655 = vmatmul.msk.f32.vlgmr.msra.gmra.mxu2 %vm448_vm2, %v419_v53 }
  0xbe   : > { %492 = vmatpush.msra.mxu1 %v272_v52 }
  0xc0   : > { %493 = vmatpush.msra.mxu1 %v250_v46 }
  0xc1   : > { %653 = vmatmul.msk.f32.vlgmr.msra.gmra.mxu1 %vm448_vm2, %v419_v53 }
  0xc2   : > { %v427_v55 = vld [vmem:[#allocation2 + $0x30] sm:$0xff] }
  0xc3   : > { %468 = vmatpush.msra.mxu0 %v427_v55  ;;  %665 = vmatpush.msra.mxu3 %v427_v55  ;;  %v424_v57 = vld [vmem:[#allocation2 + $0x18] sm:$0xff] }
  0xc5   : > { %469 = vmatpush.msra.mxu0 %v424_v57  ;;  %666 = vmatpush.msra.mxu3 %v424_v57 }
  0xc6   : > { %656 = vmatmul.msk.f32.gmra.mxu2 %vm448_vm2, %v420_v56 }
  0xc7   : > { %470 = vmatpush.msra.mxu0 %v421_v58  ;;  %667 = vmatpush.msra.mxu3 %v421_v58 }
  0xc8   : > { %651 = vmatmul.msk.f32.vlgmr.msra.gmra.mxu0 %vm448_vm2, %v419_v53  ;;  %652 = vmatmul.msk.f32.vlgmr.msra.gmra.mxu3 %vm448_vm2, %v420_v56 }
  0xc9   : > { %654 = vmatmul.msk.f32.gmra.mxu1 %vm448_vm2, %v420_v56 }
 0x13e   : > { %v495_v60 = vpop.f32.mrf.mxu1 }
 0x13f   : > { %525 = vst [vmem:[%s204_s12 + $0x8] sm:$0xff] %v495_v60  ;;  %v539_v1 = vmul.f32 %v533_v61, %v495_v60 }
 0x140   : > { %v518_v63 = vpop.f32.mrf.mxu2 }
 0x141   : > { %526 = vst.msk [vmem:[%s204_s12 + $0x10] sm:$0xff] %vm211_vm0, %v518_v63  ;;  %v540_v2 = vmul.f32 %v534_v62, %v518_v63  ;;  %v548_v6 = vmul.f32 %v539_v1, %v539_v1 }
 0x143   : > { %v549_v4 = vmul.f32 %v540_v2, %v540_v2  ;;  %v542_v7 = vsel %vm211_vm0, %v540_v2, 0.0 }
 0x145   : > { %v472_v3 = vpop.f32.mrf.mxu0  ;;  %v551_v10 = vsel %vm211_vm0, %v549_v4, 0.0 }
 0x146   : > { %524 = vst [vmem:[%s204_s12] sm:$0xff] %v472_v3  ;;  %v538_v5 = vmul.f32 %v532_v0, %v472_v3  ;;  %v498_v16 = vpop.f32.mrf.mxu1 }
 0x147   : > { %528 = vst [vmem:[%s204_s12 + $0x20] sm:$0xff] %v498_v16 }
 0x148   : > { %v547_v8 = vmul.f32 %v538_v5, %v538_v5  ;;  %v541_v9 = vadd.f32 %v539_v1, %v538_v5 }
 0x149   : > { %v521_v15 = vpop.f32.mrf.mxu2 }
 0x14a   : > { %v543_v11 = vadd.f32 %v542_v7, %v541_v9  ;;  %v550_v12 = vadd.f32 %v548_v6, %v547_v8  ;;  %529 = vst.msk [vmem:[%s204_s12 + $0x28] sm:$0xff] %vm211_vm0, %v521_v15 }
 0x14b   : > { %v475_v14 = vpop.f32.mrf.mxu3 }
 0x14c   : > { %544 = vadd.xlane.f32.xlu0 %v543_v11  ;;  %v552_v13 = vadd.f32 %v551_v10, %v550_v12  ;;  %527 = vst [vmem:[%s204_s12 + $0x18] sm:$0xff] %v475_v14 }
 0x14e   : > { %553 = vadd.xlane.f32.xlu1 %v552_v13 }
 0x1bf   : > { %v545_v17 = vpop.xlane.xlu0 %544 }
 0x1c0   : > { %546 = vst.msk [vmem:[%s208_s18] sm:$0xff] %vm315_vm8, %v545_v17 }
 0x1c1   : > { %v554_v18 = vpop.xlane.xlu1 %553 }
 0x1c2   : > { %556 = vst.msk [vmem:[%s208_s18] sm:$0xff] %vm555_vm3, %v554_v18 }
 0x1c3 PF: > { %s15_s15 = sadd.s32 1, %s693_s15  }
 0x1c4   : > { %p12_p4 = scmp.ge.s32.totalorder %s15_s15, 4  }
 0x1c6   :  { %14 = sbr.rel (!%p12_p4) target bundleno = 1 (0x1), region = 74 }

// kernel: residual_conv.4
= control target key start
LH: loop header
LB: loop body
LE: loop exit
PB: predicated region body
PF: predicated region fallthrough
CT: control target
= control target key end

     0   :  { %s755_s21 = smov 0   ;;  %s839_s0 = inlined_call_operand.vmem [shape: f32[2,16,324], index: 0, kind: input, shape index: {}]   ;;  %s840_s1 = inlined_call_operand.vmem [shape: f32[1,324], index: 1, kind: input, shape index: {}]   ;;  %s841_s2 = inlined_call_operand.vmem [shape: f32[8,1], index: 2, kind: input, shape index: {}]   ;;  %s842_s3 = inlined_call_operand.vmem [shape: f32[8,1], index: 3, kind: input, shape index: {}]   ;;  %s843_s4 = inlined_call_operand.vmem [shape: f32[8,72], index: 4, kind: input, shape index: {}]   ;;  %s844_s5 = inlined_call_operand.vmem [shape: f32[2,8,324], index: 5, kind: output, shape index: {0}]   ;;  %s845_s6 = inlined_call_operand.vmem [shape: f32[2,8,2], index: 6, kind: output, shape index: {1}]  }
   0x1 LB: > { %s668_s22 = sadd.s32 4294967295, %s708_s21   ;;  %p672_p0 = scmp.ge.s32.totalorder %s708_s21, 1  ;;  %s708_s21 = sphi %s755_s21, %s17_s21  }
   0x2   : > { %p215_p1 = scmp.lt.s32.totalorder %s708_s21, 3 }
   0x4   : > { %p216_p2 = pnand %p672_p0, %p215_p1 }
   0x5   : > { %p249_p3 = scmp.lt.s32.totalorder (!%p216_p2), %s668_s22, 1  ;;  %s712_s9 = smov (!%p216_p2), 111  }
   0x6   : > { %219 = sbr.rel (%p216_p2) target bundleno = 581 (0x245), region = 40  ;;  %s713_s10 = smov (!%p216_p2), 109  }
   0x7   : > { %s714_s11 = smov (!%p216_p2), 110   ;;  %s715_s12 = smov (!%p216_p2), 127  }
   0x8   : > { %s716_s13 = smov (!%p216_p2), 1   ;;  %s717_s14 = smov (!%p216_p2), 18  }
   0x9   : > { %s718_s15 = smov (!%p216_p2), 17   ;;  %s719_s16 = smov (!%p216_p2), 19  }
   0xb   : > { %v263_v0 = vld [vmem:[%s841_s2] sm:$0xff]  ;;  %v710_v1 = vmov 0   ;;  %vm300_vm0 = vcmask 556032   ;;  %v711_v3 = vmov 0.0   ;;  %s847_s22 = smov (!%p249_p3, %s668_s22), 1  ;;  %vm426_vm1 = vcmask 416768  }
   0xc   : > { %701 = vset.pattern.permute.xlu0 %v710_v1  ;;  %v275_v2 = vld [vmem:[%s842_s3] sm:$0xff]  ;;  %319 = vst.msk [vmem:[#allocation2 + $0xa0] sm:$0xff] %vm300_vm0, %v711_v3  ;;  %s681_s27 = smul.u32 48, %s847_s22  ;;  %vm458_vm2 = vcmask 400384   ;;  %vm418_vm3 = vcmask 908288   ;;  %vm450_vm4 = vcmask 891904  }
   0xd   : > { %269 = vperm.xlu0 %701, %v263_v0   ;;  %298 = vst [vmem:[#allocation2] sm:$0xff] %v711_v3  ;;  %v287_v8 = vld [vmem:[%s840_s1] sm:$0x7]  ;;  %vm442_vm5 = vcmask 408576   ;;  %vm434_vm6 = vcmask 900096   ;;  %vm410_vm7 = vcmask 547840  }
   0xe   : > { %301 = vst.msk [vmem:[#allocation2 + $0x10] sm:$0xff] %vm300_vm0, %v711_v3  ;;  %s253_s30 = scalar_lea.vmem %s839_s0, %s681_s27  ;;  %v289_v12 = vperm.slane %v287_v8, 0  ;;  %v290_v13 = vperm.slane %v287_v8, 1  ;;  %v291_v15 = vperm.slane %v287_v8, 2  ;;  %vm389_vm8 = vcmask 1047560   ;;  %s682_s19 = smul.u32 24, %s847_s22 }
   0xf   : > { %302 = vst [vmem:[#allocation2 + $0x18] sm:$0xff] %v711_v3  ;;  %v264_v5 = vld [vmem:[%s253_s30] sm:$0xff]  ;;  %v265_v6 = vld [vmem:[%s253_s30 + $0x8] sm:$0xff]  ;;  %v266_v7 = vld [vmem:[%s253_s30 + $0x10] sm:$0xff]  ;;  %vm402_vm9 = vcmask 1039360   ;;  %vm383_vm10 = vcmask 7168  }
  0x10   : > { %304 = vst.msk [vmem:[#allocation2 + $0x28] sm:$0xff] %vm300_vm0, %v711_v3  ;;  %vm373_vm11 = vcmask 1047688   ;;  %vm367_vm12 = vcmask 138240   ;;  %vm351_vm13 = vcmask 146432   ;;  %vm357_vm14 = vcmask 1047696   ;;  %s258_s26 = scalar_lea.vmem %s844_s5, %s682_s19  ;;  %s675_s27 = sshll.u32 %s847_s22, 3 }
  0x11   : > { %305 = vst [vmem:[#allocation2 + $0x30] sm:$0xff] %v711_v3  ;;  %vm335_vm15 = vcmask 154624   ;;  %s262_s30 = scalar_lea.vmem %s845_s6, %s675_s27 }
  0x12   : > { %307 = vst.msk [vmem:[#allocation2 + $0x40] sm:$0xff] %vm300_vm0, %v711_v3 }
  0x13   : > { %308 = vst [vmem:[#allocation2 + $0x48] sm:$0xff] %v711_v3 }
  0x14   : > { %310 = vst.msk [vmem:[#allocation2 + $0x58] sm:$0xff] %vm300_vm0, %v711_v3 }
  0x15   : > { %278 = vperm.xlu0 %701, %v275_v2   ;;  %313 = vst.msk [vmem:[#allocation2 + $0x70] sm:$0xff] %vm300_vm0, %v711_v3 }
  0x16   : > { %316 = vst.msk [vmem:[#allocation2 + $0x88] sm:$0xff] %vm300_vm0, %v711_v3 }
  0x17   : > { %322 = vst.msk [vmem:[#allocation2 + $0xb8] sm:$0xff] %vm300_vm0, %v711_v3 }
  0x18   : > { %325 = vst.msk [vmem:[#allocation2 + $0xd0] sm:$0xff] %vm300_vm0, %v711_v3 }
  0x7f   : > { %v270_v4 = vpop.permute.xlu0 %269 }
  0x80   : > { %v272_v9 = vmul.f32 %v270_v4, %v264_v5  ;;  %v273_v10 = vmul.f32 %v270_v4, %v265_v6  ;;  %v274_v11 = vmul.f32 %v270_v4, %v266_v7 }
  0x87   : > { %v279_v14 = vpop.permute.xlu0 %278 }
  0x88   : > { %v281_v16 = vadd.f32 %v279_v14, %v272_v9  ;;  %v282_v17 = vadd.f32 %v279_v14, %v273_v10  ;;  %v283_v18 = vadd.f32 %v279_v14, %v274_v11  ;;  %v460_v11 = vld [vmem:[%s843_s4] sm:$0xff] }
  0x8a   : > { %v284_v19 = vmax.f32 %v281_v16, 0.0  ;;  %v285_v20 = vmax.f32 %v282_v17, 0.0  ;;  %v286_v21 = vmax.f32 %v283_v18, 0.0 }
  0x8c   : > { %v787_v22 = vmul.f32 %v289_v12, %v284_v19  ;;  %v789_v23 = vmul.f32 %v290_v13, %v285_v20  ;;  %v297_v24 = vmul.f32 %v291_v15, %v286_v21  ;;  %v555_v15 = vld [vmem:[%s840_s1] sm:$0x7] }
  0x8d   : > { %v558_v17 = vperm.slane %v555_v15, 1  ;;  %v559_v18 = vperm.slane %v555_v15, 2  ;;  %v557_v19 = vperm.slane %v555_v15, 0 }
  0x8e   : > { %416 = vrot.lane.b32.xlu2 %v297_v24, %s712_s9  ;;  %448 = vrot.lane.b32.xlu1 %v297_v24, %s713_s10  ;;  %395 = vst.msk [vmem:[#allocation2 + $0x70] sm:$0xff] %vm300_vm0, %v297_v24 }
  0x8f   : > { %446 = vrot.lane.b32.xlu0 %v789_v23, %s713_s10 }
  0x95   : > { %v475_v53 = vld [vmem:[#allocation2 + $0x70] sm:$0xff] }
  0x96   : > { %432 = vrot.lane.b32.xlu1 %v297_v24, %s714_s11  ;;  %444 = vrot.lane.b32.xlu2 %v787_v22, %s713_s10 }
  0x97   : > { %430 = vrot.lane.b32.xlu0 %v789_v23, %s714_s11 }
  0x9e   : > { %400 = vrot.lane.b32.xlu1 %v297_v24, %s715_s12  ;;  %428 = vrot.lane.b32.xlu2 %v787_v22, %s714_s11 }
  0x9f   : > { %379 = vrot.lane.b32.xlu0 %v789_v23, %s716_s13 }
  0xa6   : > { %412 = vrot.lane.b32.xlu1 %v787_v22, %s712_s9  ;;  %414 = vrot.lane.b32.xlu2 %v789_v23, %s712_s9 }
  0xa7   : > { %398 = vrot.lane.b32.xlu0 %v789_v23, %s715_s12 }
  0xae   : > { %381 = vrot.lane.b32.xlu1 %v297_v24, %s716_s13  ;;  %396 = vrot.lane.b32.xlu2 %v787_v22, %s715_s12 }
  0xaf   : > { %347 = vrot.lane.b32.xlu0 %v789_v23, %s717_s14 }
  0xb6   : > { %363 = vrot.lane.b32.xlu1 %v789_v23, %s718_s15  ;;  %365 = vrot.lane.b32.xlu2 %v297_v24, %s718_s15 }
  0xb7   : > { %331 = vrot.lane.b32.xlu0 %v789_v23, %s719_s16 }
  0xbe   : > { %349 = vrot.lane.b32.xlu1 %v297_v24, %s717_s14  ;;  %377 = vrot.lane.b32.xlu2 %v787_v22, %s716_s13 }
  0xbf   : > { %345 = vrot.lane.b32.xlu0 %v787_v22, %s717_s14 }
  0xc6   : > { %333 = vrot.lane.b32.xlu1 %v297_v24, %s719_s16  ;;  %361 = vrot.lane.b32.xlu2 %v787_v22, %s718_s15 }
  0xce   : > { %329 = vrot.lane.b32.xlu1 %v787_v22, %s719_s16 }
  0xe8   : > { %v417_v25 = vpop.permute.xlu2 %416 }
  0xe9   : > { %427 = vst.msk [vmem:[#allocation2 + $0xa0] sm:$0xff] %vm426_vm1, %v417_v25  ;;  %vm341_vm1 = vcmask 1047704  }
  0xf0   : > { %v445_v26 = vpop.permute.xlu2 %444  ;;  %v481_v44 = vld [vmem:[#allocation2 + $0xa0] sm:$0xff] }
  0xf8   : > { %v429_v27 = vpop.permute.xlu2 %428 }
 0x100   : > { %v449_v28 = vpop.permute.xlu1 %448  ;;  %v415_v29 = vpop.permute.xlu2 %414 }
 0x101   : > { %459 = vst.msk [vmem:[#allocation2 + $0xd0] sm:$0xff] %vm458_vm2, %v449_v28  ;;  %v447_v30 = vpop.permute.xlu0 %446  ;;  %v420_v31 = vsel %vm418_vm3, %v415_v29, %v417_v25  ;;  %vm488_vm2 = vcmask 588800  }
 0x102   : > { %v451_v32 = vsel %vm450_vm4, %v445_v26, %v447_v30  ;;  %v452_v33 = vsel %vm450_vm4, %v447_v30, %v449_v28 }
 0x103   : > { %499 = vmatpush.msra.mxu0 %v451_v32  ;;  %519 = vmatpush.msra.mxu1 %v452_v33 }
 0x108   : > { %v433_v34 = vpop.permute.xlu1 %432  ;;  %v397_v35 = vpop.permute.xlu2 %396  ;;  %v487_v36 = vld [vmem:[#allocation2 + $0xd0] sm:$0xff] }
 0x109   : > { %443 = vst.msk [vmem:[#allocation2 + $0xb8] sm:$0xff] %vm442_vm5, %v433_v34  ;;  %v431_v37 = vpop.permute.xlu0 %430  ;;  %539 = vmatpush.msra.mxu2 %v487_v36 }
 0x10a   : > { %v435_v38 = vsel %vm434_vm6, %v429_v27, %v431_v37  ;;  %v436_v39 = vsel %vm434_vm6, %v431_v37, %v433_v34 }
 0x10b   : > { %500 = vmatpush.msra.mxu0 %v435_v38  ;;  %520 = vmatpush.msra.mxu1 %v436_v39 }
 0x10d   : > { %521 = vmatpush.msra.mxu1 %v420_v31 }
 0x110   : > { %v401_v40 = vpop.permute.xlu1 %400  ;;  %v366_v41 = vpop.permute.xlu2 %365  ;;  %v484_v42 = vld [vmem:[#allocation2 + $0xb8] sm:$0xff] }
 0x111   : > { %411 = vst.msk [vmem:[#allocation2 + $0x88] sm:$0xff] %vm410_vm7, %v401_v40  ;;  %v380_v43 = vpop.permute.xlu0 %379  ;;  %540 = vmatpush.msra.mxu2 %v484_v42 }
 0x113   : > { %541 = vmatpush.msra.mxu2 %v481_v44 }
 0x118   : > { %v413_v45 = vpop.permute.xlu1 %412  ;;  %v378_v46 = vpop.permute.xlu2 %377  ;;  %v478_v47 = vld [vmem:[#allocation2 + $0x88] sm:$0xff] }
 0x119   : > { %v399_v48 = vpop.permute.xlu0 %398  ;;  %v419_v49 = vsel %vm418_vm3, %v413_v45, %v415_v29  ;;  %390 = vst.msk [vmem:[#allocation2 + $0x48] sm:$0xff] %vm389_vm8, %v378_v46  ;;  %542 = vmatpush.msra.mxu2 %v478_v47  ;;  %v384_v52 = vsel %vm383_vm10, %v378_v46, %v380_v43  ;;  %vm580_vm3 = vcmask 15368  }
 0x11a   : > { %v403_v50 = vsel %vm402_vm9, %v397_v35, %v399_v48  ;;  %v404_v51 = vsel %vm402_vm9, %v399_v48, %v401_v40  ;;  %501 = vmatpush.msra.mxu0 %v419_v49 }
 0x11b   : > { %543 = vmatpush.msra.mxu2 %v475_v53  ;;  %522 = vmatpush.msra.mxu1 %v404_v51 }
 0x11c   : > { %502 = vmatpush.msra.mxu0 %v403_v50 }
 0x11d   : > { %523 = vmatpush.msra.mxu1 %v789_v23 }
 0x11e   : > { %503 = vmatpush.msra.mxu0 %v787_v22 }
 0x11f   : > { %524 = vmatpush.msra.mxu1 %v384_v52 }
 0x120   : > { %v382_v54 = vpop.permute.xlu1 %381  ;;  %v362_v55 = vpop.permute.xlu2 %361  ;;  %v470_v56 = vld [vmem:[#allocation2 + $0x48] sm:$0xff] }
 0x121   : > { %v348_v57 = vpop.permute.xlu0 %347  ;;  %v385_v58 = vsel %vm383_vm10, %v380_v43, %v382_v54  ;;  %374 = vst.msk [vmem:[#allocation2 + $0x30] sm:$0xff] %vm373_vm11, %v362_v55  ;;  %504 = vmatpush.msra.mxu0 %v470_v56 }
 0x122   : > { %392 = vst.msk [vmem:[#allocation2 + $0x58] sm:$0xff] %vm300_vm0, %v385_v58 }
 0x128   : > { %v364_v59 = vpop.permute.xlu1 %363  ;;  %v467_v60 = vld [vmem:[#allocation2 + $0x30] sm:$0xff] }
 0x129   : > { %v332_v61 = vpop.permute.xlu0 %331  ;;  %v368_v62 = vsel %vm367_vm12, %v362_v55, %v364_v59  ;;  %v369_v63 = vsel %vm367_vm12, %v364_v59, %v366_v41  ;;  %505 = vmatpush.msra.mxu0 %v467_v60  ;;  %v472_v0 = vld [vmem:[#allocation2 + $0x58] sm:$0xff] }
 0x12a   : > { %544 = vmatpush.msra.mxu2 %v472_v0  ;;  %525 = vmatpush.msra.mxu1 %v368_v62  ;;  %376 = vst.msk [vmem:[#allocation2 + $0x40] sm:$0xff] %vm300_vm0, %v369_v63 }
 0x130   : > { %v350_v1 = vpop.permute.xlu1 %349 }
 0x131   : > { %v346_v2 = vpop.permute.xlu0 %345  ;;  %v353_v3 = vsel %vm351_vm13, %v348_v57, %v350_v1  ;;  %v469_v5 = vld [vmem:[#allocation2 + $0x40] sm:$0xff] }
 0x132   : > { %v352_v4 = vsel %vm351_vm13, %v346_v2, %v348_v57  ;;  %358 = vst.msk [vmem:[#allocation2 + $0x18] sm:$0xff] %vm357_vm14, %v346_v2  ;;  %545 = vmatpush.msra.mxu2 %v469_v5 }
 0x133   : > { %526 = vmatpush.msra.mxu1 %v352_v4  ;;  %360 = vst.msk [vmem:[#allocation2 + $0x28] sm:$0xff] %vm300_vm0, %v353_v3 }
 0x138   : > { %v334_v6 = vpop.permute.xlu1 %333 }
 0x139   : > { %v337_v7 = vsel %vm335_vm15, %v332_v61, %v334_v6  ;;  %v464_v8 = vld [vmem:[#allocation2 + $0x18] sm:$0xff] }
 0x13a   : > { %344 = vst.msk [vmem:[#allocation2 + $0x10] sm:$0xff] %vm300_vm0, %v337_v7  ;;  %506 = vmatpush.msra.mxu0 %v464_v8  ;;  %v466_v9 = vld [vmem:[#allocation2 + $0x28] sm:$0xff] }
 0x13b   : > { %546 = vmatpush.msra.mxu2 %v466_v9 }
 0x140   : > { %v330_v10 = vpop.permute.xlu1 %329 }
 0x141   : > { %v336_v12 = vsel %vm335_vm15, %v330_v10, %v332_v61  ;;  %342 = vst.msk [vmem:[#allocation2] sm:$0xff] %vm341_vm1, %v330_v10  ;;  %v463_v13 = vld [vmem:[#allocation2 + $0x10] sm:$0xff] }
 0x142   : > { %547 = vmatpush.msra.mxu2 %v463_v13  ;;  %527 = vmatpush.msra.mxu1 %v336_v12 }
 0x143   : > { %678 = vmatmul.msk.f32.vlgmr.msra.gmra.mxu2 %vm488_vm2, %v460_v11  ;;  %677 = vmatmul.msk.f32.vlgmr.msra.gmra.mxu1 %vm488_vm2, %v460_v11 }
 0x148   : > { %v461_v14 = vld [vmem:[#allocation2] sm:$0xff] }
 0x149   : > { %507 = vmatpush.msra.mxu0 %v461_v14 }
 0x14a   : > { %676 = vmatmul.msk.f32.vlgmr.msra.gmra.mxu0 %vm488_vm2, %v460_v11 }
 0x1c0   : > { %v529_v16 = vpop.f32.mrf.mxu1 }
 0x1c1   : > { %553 = vst [vmem:[%s258_s26 + $0x8] sm:$0xff] %v529_v16  ;;  %v564_v20 = vmul.f32 %v558_v17, %v529_v16 }
 0x1c3   : > { %v573_v25 = vmul.f32 %v564_v20, %v564_v20 }
 0x1c6   : > { %v549_v21 = vpop.f32.mrf.mxu2 }
 0x1c7   : > { %v509_v22 = vpop.f32.mrf.mxu0  ;;  %554 = vst.msk [vmem:[%s258_s26 + $0x10] sm:$0xff] %vm300_vm0, %v549_v21  ;;  %v565_v23 = vmul.f32 %v559_v18, %v549_v21 }
 0x1c8   : > { %552 = vst [vmem:[%s258_s26] sm:$0xff] %v509_v22  ;;  %v563_v24 = vmul.f32 %v557_v19, %v509_v22 }
 0x1c9   : > { %v574_v26 = vmul.f32 %v565_v23, %v565_v23  ;;  %v567_v27 = vsel %vm300_vm0, %v565_v23, 0.0 }
 0x1ca   : > { %v572_v28 = vmul.f32 %v563_v24, %v563_v24  ;;  %v566_v29 = vadd.f32 %v564_v20, %v563_v24 }
 0x1cb   : > { %v576_v30 = vsel %vm300_vm0, %v574_v26, 0.0 }
 0x1cc   : > { %v568_v31 = vadd.f32 %v567_v27, %v566_v29  ;;  %v575_v32 = vadd.f32 %v573_v25, %v572_v28 }
 0x1ce   : > { %569 = vadd.xlane.f32.xlu2 %v568_v31  ;;  %v577_v33 = vadd.f32 %v576_v30, %v575_v32 }
 0x1d0   : > { %578 = vadd.xlane.f32.xlu0 %v577_v33 }
 0x241   : > { %v570_v34 = vpop.xlane.xlu2 %569 }
 0x242   : > { %571 = vst.msk [vmem:[%s262_s30] sm:$0xff] %vm383_vm10, %v570_v34 }
 0x243   : > { %v579_v35 = vpop.xlane.xlu0 %578 }
 0x244   : > { %581 = vst.msk [vmem:[%s262_s30] sm:$0xff] %vm580_vm3, %v579_v35 }
 0x245 PF: > { %s17_s21 = sadd.s32 1, %s708_s21  }
 0x246   : > { %p14_p4 = scmp.ge.s32.totalorder %s17_s21, 4  }
 0x248   :  { %16 = sbr.rel (!%p14_p4) target bundleno = 1 (0x1), region = 82 }

</bundles_post_ra>
